<compile_context>
chip_gen: v7x
topology: tpu7x:2x2x1
jax: 0.10.0
libtpu: 0.0.40
codegen_flags: <defaults>
</compile_context>

<pallas_src>
import functools

import jax
import jax.numpy as jnp
from jax import lax
from jax.experimental import pallas as pl
from jax.experimental.pallas import tpu as pltpu


def cnn_block_kernel(halo_ref, x_ref, w_ref, b_ref, o_ref, stitch_ref, *,
                     kernel_size: int, dilation: int, padding: int,
                     halo_base: int, compute_dtype):
    """One (batch, time-tile) slab per grid step.

    halo_ref:   (1, 1, P, D)            lane-dense left halo for this tile
    x_ref:      (1, D, Tt)              current input tile (also the residual)
    w_ref:      (K, D, D)               conv weight, w[k, d_out, d_in] (compute dtype)
    b_ref:      (D, 1)                  conv bias (f32)
    o_ref:      (1, D, Tt)              output tile
    stitch_ref: (D, halo_base+P+Tt)     VMEM scratch holding [.. | halo | x]
    """
    x_tile = x_ref[0]                                     # (D, Tt)
    Tt = x_tile.shape[-1]
    base = halo_base                                      # = P_round - padding

    # Stitch [halo | x] once so every tap is a static slice of one scratch
    # (no per-tap full-tile concatenate copies).  x lands lane-aligned at
    # column base + padding (a multiple of 128); the halo write is tiny.
    stitch_ref[:, base:base + padding] = (
        jnp.transpose(halo_ref[0, 0]).astype(compute_dtype))        # (D, P)
    stitch_ref[:, base + padding:] = x_tile.astype(compute_dtype)   # aligned

    def tap(k):
        o = base + k * dilation
        return stitch_ref[:, o:o + Tt]                    # (D, Tt) view/load

    # K accumulating (D, D) @ (D, Tt) MXU matmuls, f32 accumulation.  Keeps at
    # most one tap live at a time (no K*D*Tt stacked buffer in VMEM).
    y = jnp.dot(w_ref[0], tap(0), preferred_element_type=jnp.float32)
    for k in range(1, kernel_size):
        y = y + jnp.dot(w_ref[k], tap(k), preferred_element_type=jnp.float32)

    y = y + b_ref[...]                                    # bias (D,1) broadcast
    y = jnp.maximum(y, 0.0)                               # ReLU
    # Dropout: identity (inference / eval mode only).
    # TODO(synk): training-mode dropout would use pltpu.prng_seed + stateful_bernoulli.
    o_ref[0] = (y + x_tile.astype(jnp.float32)).astype(o_ref.dtype)


def _pick_t_tile(t_pad: int, target: int) -> int:
    """Largest 128-multiple tile <= target that divides t_pad (t_pad % 128 == 0)."""
    if t_pad <= target:
        return t_pad
    start = (min(target, t_pad) // 128) * 128
    for cand in range(start, 127, -128):
        if t_pad % cand == 0:
            return cand
    return 128  # unreachable: 128 always divides t_pad


def cnn_block_forward(x, weight, bias, *, kernel_size: int, dilation: int,
                      cache=None, compute_dtype=jnp.bfloat16, t_tile=1024):
    """Pallas implementation of CnnBlock.forward (eval mode).

    x:      (B, D, T)
    weight: (D_out, D_in, K)   (PyTorch Conv1d layout, D_out == D_in == D)
    bias:   (D,)
    cache:  optional (B, D, padding) streaming cache.
    Returns (y, new_cache) with y: (B, D, T), new_cache: (B, D, padding).
    """
    B, D, T = x.shape
    padding = (kernel_size - 1) * dilation
    assert T >= 1
    assert padding >= 1, "kernel_size must be >= 2 (padding >= 1)"
    assert weight.shape == (D, D, kernel_size)

    if cache is None:
        head = jnp.zeros((B, D, padding), x.dtype)
    else:
        assert cache.shape == (B, D, padding), (
            f"cache must have shape {(B, D, padding)}, got {cache.shape}")
        head = cache.astype(x.dtype)

    # new_cache = last `padding` timesteps of concat([head, x]) (no big concat).
    if T >= padding:
        new_cache = x[:, :, T - padding:]
    else:
        new_cache = jnp.concatenate([head[:, :, T:], x], axis=2)

    # Pad T up to a multiple of 128 (lane-dense output stores).  The trailing
    # zero columns only produce extra output columns that are sliced off; they
    # never feed any kept output (causal conv).
    T_pad = -(-T // 128) * 128
    x_p = x if T_pad == T else jnp.pad(x, ((0, 0), (0, 0), (0, T_pad - T)))

    Tt = _pick_t_tile(T_pad, t_tile)
    nT = T_pad // Tt
    # Megacore occupancy (v7x: 2 TensorCores): ensure >= 2 grid steps when cheap.
    if B * nT == 1 and Tt % 256 == 0:
        Tt //= 2
        nT = 2
    # Halos for tiles t >= 1 are gathered from x columns [t*Tt - P, t*Tt);
    # that requires Tt >= padding, otherwise fall back to one whole tile.
    if nT > 1 and Tt < padding:
        Tt, nT = T_pad, 1

    # Per-tile left halos, gathered directly from x (no near-full copy of x),
    # lane-dense layout (B, nT, P, D) so each halo DMA is one dense transfer.
    head_t = jnp.transpose(head, (0, 2, 1))                          # (B, P, D)
    if nT == 1:
        halo = head_t[:, None]                                       # (B,1,P,D)
    else:
        cols = ((jnp.arange(1, nT) * Tt - padding)[:, None]
                + jnp.arange(padding)[None, :])                      # (nT-1, P)
        rest = jnp.transpose(x[:, :, cols], (0, 2, 3, 1))            # (B,nT-1,P,D)
        halo = jnp.concatenate([head_t[:, None], rest], axis=1)      # (B,nT,P,D)

    # Weight as (K, D, D) with w[k, d_out, d_in] = weight[d_out, d_in, k],
    # stored in the MXU compute dtype (bf16 by default: halves bytes + VMEM).
    w_kod = jnp.transpose(weight, (2, 0, 1)).astype(compute_dtype)
    b2 = bias.reshape(D, 1).astype(jnp.float32)

    p_round = -(-padding // 128) * 128        # halo region rounded up to lanes
    halo_base = p_round - padding             # x lands lane-aligned at p_round

    kern = functools.partial(cnn_block_kernel, kernel_size=kernel_size,
                             dilation=dilation, padding=padding,
                             halo_base=halo_base, compute_dtype=compute_dtype)

    itemsize = x.dtype.itemsize
    cost = pl.CostEstimate(
        flops=2 * B * D * D * kernel_size * T_pad,
        transcendentals=0,
        bytes_accessed=(2 * B * D * T_pad * itemsize                 # x in + y out
                        + B * nT * padding * D * itemsize            # halos
                        + kernel_size * D * D
                        * jnp.dtype(compute_dtype).itemsize))        # weight

    out = pl.pallas_call(
        kern,
        out_shape=jax.ShapeDtypeStruct((B, D, T_pad), x.dtype),
        grid=(B, nT),
        in_specs=[
            pl.BlockSpec((1, 1, padding, D), lambda b, t: (b, t, 0, 0)),  # halo
            pl.BlockSpec((1, D, Tt), lambda b, t: (b, 0, t)),             # x tile
            pl.BlockSpec((kernel_size, D, D), lambda b, t: (0, 0, 0)),    # weight
            pl.BlockSpec((D, 1), lambda b, t: (0, 0)),                    # bias
        ],
        out_specs=pl.BlockSpec((1, D, Tt), lambda b, t: (b, 0, t)),
        scratch_shapes=[pltpu.VMEM((D, p_round + Tt), compute_dtype)],
        compiler_params=pltpu.CompilerParams(
            dimension_semantics=("parallel", "parallel"),
            vmem_limit_bytes=48 << 20),       # fits v7x's 64 MiB physical VMEM
        cost_estimate=cost,
    )(halo, x_p, w_kod, b2)

    if T_pad != T:
        out = out[:, :, :T]
    return out, new_cache


def cnn_block_reference(x, weight, bias, *, kernel_size: int, dilation: int,
                        cache=None):
    """Pure-JAX reference mirroring the PyTorch forward (eval mode)."""
    padding = (kernel_size - 1) * dilation
    if cache is None:
        ypad = jnp.pad(x, ((0, 0), (0, 0), (padding, 0)))
    else:
        ypad = jnp.concatenate([cache, x], axis=2)
    new_cache = ypad[:, :, -padding:]
    y = lax.conv_general_dilated(
        ypad, weight, window_strides=(1,), padding="VALID",
        rhs_dilation=(dilation,), dimension_numbers=("NCH", "OIH", "NCH"))
    y = jnp.maximum(y + bias[None, :, None], 0.0) + x
    return y, new_cache


if __name__ == "__main__":
    # Small, deterministic setup: channel=8, kernel_size=3, dilation=2 -> padding=4.
    B, D, T = 2, 8, 256
    kernel_size, dilation = 3, 2
    padding = (kernel_size - 1) * dilation

    key = jax.random.PRNGKey(0)
    kx, kw, kb, kc = jax.random.split(key, 4)
    x = jax.random.normal(kx, (B, D, T), dtype=jnp.float32)
    weight = jax.random.normal(kw, (D, D, kernel_size), dtype=jnp.float32) * 0.1
    bias = jax.random.normal(kb, (D,), dtype=jnp.float32) * 0.1
    cache = jax.random.normal(kc, (B, D, padding), dtype=jnp.float32)

    y_ref, nc_ref = cnn_block_reference(x, weight, bias,
                                        kernel_size=kernel_size,
                                        dilation=dilation)

    # 1) f32 compute, time axis tiled into 2x128 (exercises the halo gather path).
    y, nc = cnn_block_forward(x, weight, bias, kernel_size=kernel_size,
                              dilation=dilation, t_tile=128,
                              compute_dtype=jnp.float32)
    y = jax.block_until_ready(y)
    nc = jax.block_until_ready(nc)
    assert y.shape == (B, D, T) and nc.shape == (B, D, padding)
    assert jnp.allclose(y, y_ref, atol=1e-4, rtol=1e-4)
    assert jnp.allclose(nc, nc_ref)

    # 2) f32 compute, with streaming cache, single time tile per batch.
    y2, nc2 = cnn_block_forward(x, weight, bias, kernel_size=kernel_size,
                                dilation=dilation, cache=cache,
                                compute_dtype=jnp.float32)
    y2 = jax.block_until_ready(y2)
    nc2 = jax.block_until_ready(nc2)
    y2_ref, nc2_ref = cnn_block_reference(x, weight, bias,
                                          kernel_size=kernel_size,
                                          dilation=dilation, cache=cache)
    assert jnp.allclose(y2, y2_ref, atol=1e-4, rtol=1e-4)
    assert jnp.allclose(nc2, nc2_ref)

    # 3) default bf16 MXU inputs / f32 accumulate (fast path), looser tolerance.
    y3, nc3 = cnn_block_forward(x, weight, bias, kernel_size=kernel_size,
                                dilation=dilation, t_tile=128)
    y3 = jax.block_until_ready(y3)
    nc3 = jax.block_until_ready(nc3)
    assert jnp.allclose(y3, y_ref, atol=5e-2, rtol=5e-2)
    assert jnp.allclose(nc3, nc_ref)

    # 4) ragged T (exercises the pad-to-128 path + halo gather), f32 compute.
    Tr = 200
    xr = x[:, :, :Tr]
    yr, ncr = cnn_block_forward(xr, weight, bias, kernel_size=kernel_size,
                                dilation=dilation, t_tile=128,
                                compute_dtype=jnp.float32)
    yr = jax.block_until_ready(yr)
    ncr = jax.block_until_ready(ncr)
    yr_ref, ncr_ref = cnn_block_reference(xr, weight, bias,
                                          kernel_size=kernel_size,
                                          dilation=dilation)
    assert yr.shape == (B, D, Tr) and ncr.shape == (B, D, padding)
    assert jnp.allclose(yr, yr_ref, atol=1e-4, rtol=1e-4)
    assert jnp.allclose(ncr, ncr_ref)

    print("KERNEL_OK")
</pallas_src>

<mosaic_0001>
module attributes {stable_mosaic.version = 11 : i64} {
  func.func @cnn_block_kernel(%arg0: i32, %arg1: i32, %arg2: memref<1x1x4x8xf32, #tpu.memory_space<vmem>>, %arg3: memref<1x8x128xf32, #tpu.memory_space<vmem>>, %arg4: memref<3x8x8xf32, #tpu.memory_space<vmem>>, %arg5: memref<8x1xf32, #tpu.memory_space<vmem>>, %arg6: memref<1x8x128xf32, #tpu.memory_space<vmem>>, %arg7: memref<8x256xf32, #tpu.memory_space<vmem>>) attributes {dimension_semantics = [#tpu.dimension_semantics<parallel>, #tpu.dimension_semantics<parallel>], iteration_bounds = array<i64: 2, 2>, scalar_prefetch = 0 : i64, scratch_operands = 1 : i64, tpu.core_type = #tpu.core_type<tc>, window_params = [{transform_indices = @transform_0, window_bounds = array<i64: 1, 1, 4, 8>}, {transform_indices = @transform_1, window_bounds = array<i64: 1, 8, 128>}, {pipeline_mode = #tpu.pipeline_mode<synchronous>, transform_indices = @transform_2, window_bounds = array<i64: 3, 8, 8>}, {pipeline_mode = #tpu.pipeline_mode<synchronous>, transform_indices = @transform_3, window_bounds = array<i64: 8, 1>}, {transform_indices = @transform_4, window_bounds = array<i64: 1, 8, 128>}]} {
    %c0 = arith.constant 0 : index
    %c0_0 = arith.constant 0 : index
    %c0_1 = arith.constant 0 : index
    %0 = vector.load %arg3[%c0, %c0_0, %c0_1] : memref<1x8x128xf32, #tpu.memory_space<vmem>>, vector<1x8x128xf32>
    %1 = vector.shape_cast %0 : vector<1x8x128xf32> to vector<8x128xf32>
    %c0_2 = arith.constant 0 : index
    %c0_3 = arith.constant 0 : index
    %c0_4 = arith.constant 0 : index
    %c0_5 = arith.constant 0 : index
    %2 = vector.load %arg2[%c0_2, %c0_3, %c0_4, %c0_5] : memref<1x1x4x8xf32, #tpu.memory_space<vmem>>, vector<1x1x4x8xf32>
    %3 = vector.shape_cast %2 : vector<1x1x4x8xf32> to vector<4x8xf32>
    %4 = tpu.transpose %3, [1, 0] : vector<4x8xf32> -> vector<8x4xf32>
    %c0_6 = arith.constant 0 : index
    %c124 = arith.constant 124 : index
    %5 = vector.load %arg7[%c0_6, %c124] : memref<8x256xf32, #tpu.memory_space<vmem>>, vector<8x4xf32>
    tpu.vector_store %arg7[%c0_6, %c124], %4 {strides = array<i32>} : memref<8x256xf32, #tpu.memory_space<vmem>>, vector<8x4xf32>,
    %c0_7 = arith.constant 0 : index
    %c128 = arith.constant 128 : index
    %6 = vector.load %arg7[%c0_7, %c128] : memref<8x256xf32, #tpu.memory_space<vmem>>, vector<8x128xf32>
    tpu.vector_store %arg7[%c0_7, %c128], %1 {strides = array<i32>} : memref<8x256xf32, #tpu.memory_space<vmem>>, vector<8x128xf32>,
    %c0_8 = arith.constant 0 : index
    %c0_9 = arith.constant 0 : index
    %c0_10 = arith.constant 0 : index
    %7 = vector.load %arg4[%c0_8, %c0_9, %c0_10] : memref<3x8x8xf32, #tpu.memory_space<vmem>>, vector<1x8x8xf32>
    %8 = vector.shape_cast %7 : vector<1x8x8xf32> to vector<8x8xf32>
    %c0_11 = arith.constant 0 : index
    %c124_12 = arith.constant 124 : index
    %9 = vector.load %arg7[%c0_11, %c124_12] : memref<8x256xf32, #tpu.memory_space<vmem>>, vector<8x128xf32>
    %cst = arith.constant dense<0.000000e+00> : vector<8x128xf32>
    %10 = tpu.matmul %8, %9, %cst {dimension_numbers = #tpu.dot_dimension_numbers<[1], [0], [0], [1], [0, 0, 1, 1], [], []>} : vector<8x8xf32>, vector<8x128xf32>, vector<8x128xf32> -> vector<8x128xf32>
    %c1 = arith.constant 1 : index
    %c0_13 = arith.constant 0 : index
    %c0_14 = arith.constant 0 : index
    %11 = vector.load %arg4[%c1, %c0_13, %c0_14] : memref<3x8x8xf32, #tpu.memory_space<vmem>>, vector<1x8x8xf32>
    %12 = vector.shape_cast %11 : vector<1x8x8xf32> to vector<8x8xf32>
    %c0_15 = arith.constant 0 : index
    %c126 = arith.constant 126 : index
    %13 = vector.load %arg7[%c0_15, %c126] : memref<8x256xf32, #tpu.memory_space<vmem>>, vector<8x128xf32>
    %cst_16 = arith.constant dense<0.000000e+00> : vector<8x128xf32>
    %14 = tpu.matmul %12, %13, %cst_16 {dimension_numbers = #tpu.dot_dimension_numbers<[1], [0], [0], [1], [0, 0, 1, 1], [], []>} : vector<8x8xf32>, vector<8x128xf32>, vector<8x128xf32> -> vector<8x128xf32>
    %15 = arith.addf %10, %14 : vector<8x128xf32>
    %c2 = arith.constant 2 : index
    %c0_17 = arith.constant 0 : index
    %c0_18 = arith.constant 0 : index
    %16 = vector.load %arg4[%c2, %c0_17, %c0_18] : memref<3x8x8xf32, #tpu.memory_space<vmem>>, vector<1x8x8xf32>
    %17 = vector.shape_cast %16 : vector<1x8x8xf32> to vector<8x8xf32>
    %c0_19 = arith.constant 0 : index
    %c128_20 = arith.constant 128 : index
    %18 = vector.load %arg7[%c0_19, %c128_20] : memref<8x256xf32, #tpu.memory_space<vmem>>, vector<8x128xf32>
    %cst_21 = arith.constant dense<0.000000e+00> : vector<8x128xf32>
    %19 = tpu.matmul %17, %18, %cst_21 {dimension_numbers = #tpu.dot_dimension_numbers<[1], [0], [0], [1], [0, 0, 1, 1], [], []>} : vector<8x8xf32>, vector<8x128xf32>, vector<8x128xf32> -> vector<8x128xf32>
    %20 = arith.addf %15, %19 : vector<8x128xf32>
    %c0_22 = arith.constant 0 : index
    %c0_23 = arith.constant 0 : index
    %21 = vector.load %arg5[%c0_22, %c0_23] : memref<8x1xf32, #tpu.memory_space<vmem>>, vector<8x1xf32>
    %22 = vector.broadcast %21 : vector<8x1xf32> to vector<8x128xf32>
    %23 = arith.addf %20, %22 : vector<8x128xf32>
    %cst_24 = arith.constant 0.000000e+00 : f32
    %24 = vector.broadcast %cst_24 : f32 to vector<8x128xf32>
    %25 = arith.maximumf %23, %24 : vector<8x128xf32>
    %26 = arith.addf %25, %1 : vector<8x128xf32>
    %c0_25 = arith.constant 0 : index
    %c0_26 = arith.constant 0 : index
    %c0_27 = arith.constant 0 : index
    %27 = vector.load %arg6[%c0_25, %c0_26, %c0_27] : memref<1x8x128xf32, #tpu.memory_space<vmem>>, vector<1x8x128xf32>
    %28 = vector.shape_cast %27 : vector<1x8x128xf32> to vector<8x128xf32>
    %29 = vector.shape_cast %26 : vector<8x128xf32> to vector<1x8x128xf32>
    tpu.vector_store %arg6[%c0_25, %c0_26, %c0_27], %29 {strides = array<i32>} : memref<1x8x128xf32, #tpu.memory_space<vmem>>, vector<1x8x128xf32>,
    return
  }
  func.func @transform_0(%arg0: i32, %arg1: i32) -> (i32, i32, i32, i32) {
    %c0_i32 = arith.constant 0 : i32
    %c0_i32_0 = arith.constant 0 : i32
    %c0_i32_1 = arith.constant 0 : i32
    return %arg0, %arg1, %c0_i32, %c0_i32_0 : i32, i32, i32, i32
  }
  func.func @transform_1(%arg0: i32, %arg1: i32) -> (i32, i32, i32) {
    %c0_i32 = arith.constant 0 : i32
    %c0_i32_0 = arith.constant 0 : i32
    return %arg0, %c0_i32, %arg1 : i32, i32, i32
  }
  func.func @transform_2(%arg0: i32, %arg1: i32) -> (i32, i32, i32) {
    %c0_i32 = arith.constant 0 : i32
    %c0_i32_0 = arith.constant 0 : i32
    %c0_i32_1 = arith.constant 0 : i32
    %c0_i32_2 = arith.constant 0 : i32
    return %c0_i32, %c0_i32_0, %c0_i32_1 : i32, i32, i32
  }
  func.func @transform_3(%arg0: i32, %arg1: i32) -> (i32, i32) {
    %c0_i32 = arith.constant 0 : i32
    %c0_i32_0 = arith.constant 0 : i32
    %c0_i32_1 = arith.constant 0 : i32
    return %c0_i32, %c0_i32_0 : i32, i32
  }
  func.func @transform_4(%arg0: i32, %arg1: i32) -> (i32, i32, i32) {
    %c0_i32 = arith.constant 0 : i32
    %c0_i32_0 = arith.constant 0 : i32
    return %arg0, %c0_i32, %arg1 : i32, i32, i32
  }
}

</mosaic_0001>

<bundles_post_ra>
// kernel: tpu_custom_call.1
= control target key start
LH: loop header
LB: loop body
LE: loop exit
PB: predicated region body
PF: predicated region fallthrough
CT: control target
= control target key end

     0   :  { %s1386_s0 = inlined_call_operand.hbm [shape: f32[2,2,4,8], index: 0, kind: input, shape index: {}]   ;;  %s1387_s1 = inlined_call_operand.hbm [shape: f32[2,8,256], index: 1, kind: input, shape index: {}]   ;;  %s1388_s2 = inlined_call_operand.hbm [shape: f32[3,8,8], index: 2, kind: input, shape index: {}]   ;;  %s1389_s3 = inlined_call_operand.vmem [shape: f32[8,1], index: 3, kind: input, shape index: {}]   ;;  %s1390_s4 = inlined_call_operand.hbm [shape: f32[2,8,256], index: 4, kind: output, shape index: {}]  }
   0x1   :  { %1399 = sst [smem:[#allocation17_spill]] %s1386_s0 }
   0x2   :  { %1400 = sst [smem:[#allocation18_spill]] %s1388_s2 }
   0x3   :  { %1401 = sst [smem:[#allocation19_spill]] %s1390_s4 }
   0x4   :  { %9 = vsyncpa [#allocation4], 0 }
   0x5   :  { %11 = vsyncpa [#allocation4 + $0x1], 0 }
   0x6   :  { %12 = vsyncpa [#allocation7], 0 }
   0x7   :  { %14 = vsyncpa [#allocation7 + $0x1], 0 }
   0x8   :  { %15 = vsyncpa [#allocation5], 0 }
   0x9   :  { %17 = vsyncpa [#allocation5 + $0x1], 0  ;;  %s1098_s15 = smov 0   ;;  %s1100_s16 = smov 0  }
   0xa   :  { %s1102_s17 = smov 0   ;;  %s1104_s18 = smov 0  }
   0xb   :  { %s1106_s19 = smov 0   ;;  %s1108_s20 = smov 0  }
   0xc   :  { %s1110_s21 = smov 0   ;;  %s1112_s22 = smov 0  }
   0xd LB: > { %1402 = sst [smem:[#allocation14_spill]] %s1031_s15  ;;  %s1139_s23 = sadd.s32 4294967295, %s1059_s22   ;;  %s1059_s22 = sphi %s1112_s22, %s23_s22   ;;  %s1055_s21 = sphi %s1110_s21, %s1431_s21   ;;  %s1051_s20 = sphi %s1108_s20, %s1430_s20   ;;  %s1047_s19 = sphi %s1106_s19, %s1429_s19   ;;  %s1043_s18 = sphi %s1104_s18, %s1428_s18   ;;  %s1039_s17 = sphi %s1102_s17, %s1427_s17   ;;  %s1035_s16 = sphi %s1100_s16, %s1426_s16   ;;  %s1031_s15 = sphi %s1098_s15, %s1425_s15  }
   0xe   : > { %s717_s24 = sadd.s32 4294967294, %s1059_s22   ;;  %p57_p0 = scmp.ne.s32.totalorder %s1035_s16, %s1031_s15 }
   0xf   : > { %p1391_p1 = scmp.eq.s32.totalorder %s1139_s23, 0  ;;  %p159_p3 = scmp.eq.s32.totalorder %s717_s24, 3 }
  0x10   : > { %p718_p5 = scmp.ge.s32.totalorder %s1059_s22, 1  ;;  %p166_p7 = scmp.lt.s32.totalorder %s1059_s22, 5 }
  0x11   : > { %p1148_p4 = por %p1391_p1, %p57_p0  ;;  %p1153_p6 = por %p159_p3, %p57_p0 }
  0x12   : > { %p1158_p8 = pnand %p718_p5, %p166_p7  ;;  %s1061_s28 = smov [#allocation8]  }
  0x13   : > { %s1403_s25 = scalar_select %p1148_p4, 1, 0 }
  0x14   : > { %s1404_s26 = scalar_select %p1153_p6, 1, 0 }
  0x15   : > { %s1406_s27 = scalar_select %p1158_p8, 1, 0 }
  0x16   : > { %1405 = sst [smem:[#allocation15_spill]] %s1404_s26  ;;  %s178_s29 = sshll.u32 %s1061_s28, 4  ;;  %s179_s29 = int_to_ptr.vmem [resolvable:$true] %s178_s29 }
  0x17   : > { %p771_p9 = pneg %p1158_p8  ;;  %s1408_s2 = sld [smem:[#allocation18_spill]] }
  0x19   : > { %p1166_p10 = pnand %p771_p9, %p1391_p1 }
  0x1b   : > { %p867_p12 = pneg %p1166_p10 }
  0x1d   : > { %s865_s7 = scalar_lea.hbm %s1408_s2, 384 }
  0x1e   : > { %p866_p11 = scmp.ne.s32.totalorder %s1408_s2, %s865_s7  ;;  %p872_p3 = scmp.lt.u32.totalorder %s865_s7, %s1408_s2 }
  0x20   : > { %p868_p13 = pnand %p867_p12, %p866_p11 }
  0x22   : > { %p869_p0 = pneg %p868_p13 }
  0x24   : > { %p874_p5 = pnand %p872_p3, %p869_p0 }
  0x26   : > { %877 = shalt.err (!%p874_p5)
}
  0x27   : > { %s878_s12 = scalar_lea.vmem %s179_s29, 384  ;;  %p886_p2 = scmp.lt.s32.totalorder %s179_s29, %s179_s29 }
  0x28   : > { %p879_p7 = scmp.ne.s32.totalorder %s179_s29, %s878_s12  ;;  %p887_p6 = scmp.lt.s32.totalorder %s878_s12, %s878_s12 }
  0x2a   : > { %p881_p9 = pnand %p879_p7, %p867_p12  ;;  %p888_p4 = por %p887_p6, %p886_p2 }
  0x2c   : > { %p882_p1 = pneg %p881_p9 }
  0x2e   : > { %p889_p8 = pnand %p888_p4, %p882_p1 }
  0x30   : > { %892 = shalt.err (!%p889_p8)
}
  0x31   : > { %s1062_s13 = smov 128   ;;  %s1063_s14 = smov 8  }
  0x32   : > { %774 = dma.hbm_to_vmem [thread:$0]  (!%p1166_p10), %s1408_s2, 384, %s179_s29, [#allocation7], %s1062_s13, %s1062_s13, %s1063_s14  }
  0x33   : > { %s32_s5 = sadd.s32 1, %s1051_s20  ;;  %s35_s6 = sadd.s32 1, %s1055_s21 }
  0x34   : > { %p33_p1 = scmp.ge.s32.totalorder %s32_s5, 2  ;;  %s44_s7 = sadd.s32 1, %s1039_s17 }
  0x35   : > { %p51_p2 = scmp.ne.s32.totalorder %s1039_s17, %s1035_s16  ;;  %p52_p4 = scmp.eq.s32.totalorder %s1059_s22, 0 }
  0x36   : > { %s1433_s5 = smov (%p33_p1, %s32_s5), 0  ;;  %s1435_s6 = smov (!%p33_p1, %s35_s6), %s1055_s21 }
  0x37   : > { %1409 = sst [smem:[#allocation16_spill]] %s1433_s5  ;;  %s40_s8 = ssub.s32 %s1051_s20, %s1433_s5 }
  0x38   : > { %p37_p6 = scmp.ge.s32.totalorder %s1435_s6, 2  ;;  %p1410_p8 = scmp.eq.s32.totalorder %s1139_s23, 3 }
  0x39   : > { %p1203_p10 = por %p52_p4, %p51_p2  ;;  %p787_p12 = scmp.lt.s32.totalorder %s1059_s22, 4 }
  0x3a   : > { %p1199_p11 = por %p1410_p8, %p51_p2  ;;  %s1437_s6 = smov (%p37_p6, %s1435_s6), 0 }
  0x3b   : > { %s1211_s9 = sand.u32 1, %s1039_s17   ;;  %s722_s10 = sshll.u32 %s1055_s21, 1 }
  0x3c   : > { %s1411_s30 = scalar_select %p1199_p11, 1, 0 }
  0x3d   : > { %s39_s11 = ssub.s32 %s1055_s21, %s1437_s6  ;;  %s721_s13 = sshll.u32 %s1211_s9, 2 }
  0x3e   : > { %s41_s12 = sor.u32 %s40_s8, %s39_s11  ;;  %s1218_s14 = sadd.s32 %s1051_s20, %s722_s10 }
  0x3f   : > { %p42_p13 = scmp.eq.s32.totalorder %s41_s12, 0  ;;  %s199_s24 = scalar_lea.vmem [#allocation3], %s721_s13 }
  0x40   : > { %s208_s28 = sshll.u32 %s199_s24, 4  ;;  %s723_s5 = sshll.u32 %s1218_s14, 6  ;;  %s1224_s28 = int_to_ptr.vmem [resolvable:$true] %s208_s28 }
  0x41   : > { %s1221_s2 = scalar_select %p42_p13, %s1039_s17, %s44_s7  }
  0x42   : > { %s1413_s0 = sld [smem:[#allocation17_spill]]  ;;  %p1235_p0 = pnand %p787_p12, %p1203_p10 }
  0x43   : > { %s215_s7 = sand.u32 1, %s1059_s22   ;;  %s726_s10 = sshll.u32 %s1218_s14, 7 }
  0x44   : > { %s196_s11 = scalar_lea.sflag [#allocation4], %s1211_s9  ;;  %p895_p5 = pneg %p1235_p0 }
  0x48   : > { %s1229_s4 = scalar_lea.hbm %s1413_s0, %s723_s5  ;;  %s898_s5 = scalar_lea.hbm %s1413_s0, 256 }
  0x49   : > { %s893_s12 = scalar_lea.hbm %s1229_s4, 64  ;;  %p899_p1 = scmp.lt.u32.totalorder %s1229_s4, %s1413_s0 }
  0x4a   : > { %p894_p3 = scmp.ne.s32.totalorder %s1229_s4, %s893_s12  ;;  %p900_p2 = scmp.lt.u32.totalorder %s898_s5, %s893_s12 }
  0x4b   : > { %p902_p6 = scmp.lt.u32.totalorder %s893_s12, %s1229_s4 }
  0x4c   : > { %p896_p7 = pnand %p895_p5, %p894_p3  ;;  %p901_p4 = por %p900_p2, %p899_p1 }
  0x4e   : > { %p897_p9 = pneg %p896_p7  ;;  %p903_p8 = por %p902_p6, %p901_p4 }
  0x50   : > { %p904_p10 = pnand %p903_p8, %p897_p9 }
  0x52   : > { %907 = shalt.err (!%p904_p10)
}
  0x53   : > { %s908_s24 = scalar_lea.vmem %s1224_s28, 64  ;;  %s1064_s15 = smov [#allocation3]  }
  0x54   : > { %p909_p12 = scmp.ne.s32.totalorder %s1224_s28, %s908_s24  ;;  %s913_s26 = sshll.u32 %s1064_s15, 4  ;;  %s914_s26 = int_to_ptr.vmem [resolvable:$false] %s913_s26 }
  0x55   : > { %s915_s29 = scalar_lea.vmem %s914_s26, 128  ;;  %p916_p7 = scmp.lt.s32.totalorder %s1224_s28, %s914_s26 }
  0x56   : > { %p911_p13 = pnand %p909_p12, %p895_p5  ;;  %p917_p1 = scmp.lt.s32.totalorder %s915_s29, %s908_s24 }
  0x58   : > { %p912_p3 = pneg %p911_p13  ;;  %p918_p2 = por %p917_p1, %p916_p7 }
  0x5a   : > { %p919_p4 = pnand %p918_p2, %p912_p3 }
  0x5c   : > { %922 = shalt.err (!%p919_p4)
}
  0x5d   : > { %778 = dma.hbm_to_vmem [thread:$0]  (!%p1235_p0), %s1229_s4, 64, %s1224_s28, %s196_s11  }
  0x5e   : > { %s724_s12 = sshll.u32 %s1211_s9, 3  ;;  %s1273_s15 = scalar_lea.hbm %s1387_s1, %s726_s10 }
  0x5f   : > { %s219_s24 = scalar_lea.vmem [#allocation6], %s724_s12  ;;  %s216_s29 = scalar_lea.sflag [#allocation7], %s215_s7 }
  0x60   : > { %s228_s26 = sshll.u32 %s219_s24, 4  ;;  %s923_s0 = scalar_lea.hbm %s1273_s15, 128  ;;  %s229_s26 = int_to_ptr.vmem [resolvable:$true] %s228_s26 }
  0x61   : > { %p924_p9 = scmp.ne.s32.totalorder %s1273_s15, %s923_s0  ;;  %s928_s14 = scalar_lea.hbm %s1387_s1, 512 }
  0x62   : > { %p929_p10 = scmp.lt.u32.totalorder %s1273_s15, %s1387_s1  ;;  %p930_p12 = scmp.lt.u32.totalorder %s928_s14, %s923_s0 }
  0x63   : > { %p926_p6 = pnand %p924_p9, %p895_p5  ;;  %p932_p3 = scmp.lt.u32.totalorder %s923_s0, %s1273_s15 }
  0x64   : > { %p931_p13 = por %p930_p12, %p929_p10 }
  0x65   : > { %p927_p8 = pneg %p926_p6 }
  0x66   : > { %p933_p7 = por %p932_p3, %p931_p13 }
  0x68   : > { %p934_p1 = pnand %p933_p7, %p927_p8 }
  0x6a   : > { %937 = shalt.err (!%p934_p1)
}
  0x6b   : > { %s938_s7 = scalar_lea.vmem %s229_s26, 128  ;;  %s1065_s11 = smov [#allocation6]  }
  0x6c   : > { %p939_p2 = scmp.ne.s32.totalorder %s229_s26, %s938_s7  ;;  %s943_s12 = sshll.u32 %s1065_s11, 4  ;;  %s944_s12 = int_to_ptr.vmem [resolvable:$false] %s943_s12 }
  0x6d   : > { %s945_s5 = scalar_lea.vmem %s944_s12, 256  ;;  %p946_p6 = scmp.lt.s32.totalorder %s229_s26, %s944_s12 }
  0x6e   : > { %p941_p4 = pnand %p939_p2, %p895_p5  ;;  %p947_p11 = scmp.lt.s32.totalorder %s945_s5, %s938_s7 }
  0x70   : > { %p942_p9 = pneg %p941_p4  ;;  %p948_p10 = por %p947_p11, %p946_p6 }
  0x72   : > { %p949_p12 = pnand %p948_p10, %p942_p9 }
  0x74   : > { %952 = shalt.err (!%p949_p12)
}
  0x75   : > { %781 = dma.hbm_to_vmem [thread:$0]  (!%p1235_p0), %s1273_s15, 128, %s229_s26, %s216_s29  }
  0x76   : > { %p1415_p8 = scmp.ne.s32.totalorder %s1406_s27, 0 }
  0x77   : > { %s1299_s0 = sand.u32 (!%p1415_p8), 1, %s1035_s16   ;;  %p1416_p5 = scmp.ne.s32.totalorder (!%p1415_p8), %s1403_s25, 0 }
  0x78   : > { %237 = sbr.rel (%p1415_p8) target bundleno = 748 (0x2ec), region = 36  ;;  %s728_s13 = sshll.u32 (!%p1415_p8), %s1299_s0, 2 }
  0x79   : > { %s240_s24 = scalar_lea.sflag (!%p1415_p8), [#allocation4], %s1299_s0  ;;  %s243_s4 = scalar_lea.vmem (!%p1415_p8), [#allocation3], %s728_s13 }
  0x7f   : > { %1014 = dma.done.wait (%p1416_p5), %s240_s24, 64  }
  0x80   : > { %1016 = vsyncadd (%p1416_p5), %s240_s24, 4294967232  ;;  %s248_s27 = sand.u32 1, %s1139_s23   ;;  %s729_s8 = sshll.u32 %s1299_s0, 3 }
  0x81   : > { %s249_s15 = scalar_lea.sflag [#allocation7], %s248_s27  ;;  %s252_s26 = scalar_lea.vmem [#allocation6], %s729_s8 }
  0x82   : > { %1018 = dma.done.wait (%p1416_p5), %s249_s15, 128  }
  0x83   : > { %1020 = vsyncadd (%p1416_p5), %s249_s15, 4294967168  ;;  %p1417_p11 = scmp.eq.s32.totalorder %s1139_s23, 0 }
  0x85   : > { %1022 = dma.done.wait (%p1417_p11), [#allocation7], 384   ;;  %p1418_p0 = pmov %p1417_p11 }
  0x86   : > { %v287_v0 = vld [vmem:[%s243_s4] sm:$0xf]  ;;  %v286_v1 = vld [vmem:[%s252_s26] sm:$0xff]  ;;  %s1066_s29 = smov 2   ;;  %s1067_s9 = smov 124   ;;  %v1068_v3 = vmov 0.0  }
  0x87   : > { %1024 = vsyncadd (%p1418_p0), [#allocation7], 4294966912  ;;  %288 = vxpose.xlu0.b32.start.end [1/1] (short) (narrow) %v287_v0, 8  ;;  %336 = vrot.lane.b32.xlu1 %v286_v1, %s1066_s29  ;;  %vm324_vm0 = vcmask 1048544   ;;  %vm1069_vm1 = vmmov 0   ;;  %v1070_v5 = vmov 0  }
  0x88   : > { %746 = vmatprep.subr.mxu0 %v1068_v3  ;;  %751 = vmatprep.subr.mxu1 %v1068_v3  ;;  %s1071_s23 = smov 4   ;;  %v571_v7 = vld [vmem:[%s1389_s3] sm:$0xff]  ;;  %vm338_vm2 = vcmask 15360   ;;  %v331_v10 = vld [vmem:[#allocation8 + $0x8] sm:$0xff]  ;;  %vm341_vm3 = vcmask 64512   ;;  %v496_v13 = vld [vmem:[#allocation8 + $0x10] sm:$0xff] }
  0x89   : > { %748 = vmatprep.mubr.msk.f32.mxu0 %vm1069_vm1, %v1068_v3  ;;  %753 = vmatprep.mubr.msk.f32.mxu1 %vm1069_vm1, %v1068_v3  ;;  %vm419_vm4 = vcmask 31744   ;;  %v327_v15 = vld [vmem:[#allocation8] sm:$0xff]  ;;  %s736_s28 = sshll.u32 %s1047_s19, 1  ;;  %s285_s11 = scalar_lea.vmem [#allocation9], %s729_s8 }
  0x8a   : > { %863 = vset.pattern.permute.xlu1 %v1070_v5  ;;  %s593_s10 = sadd.s32 %s1043_s18, %s736_s28  ;;  %s597_s12 = sshll.u32 %s285_s11, 4  ;;  %s1334_s12 = int_to_ptr.vmem [resolvable:$true] %s597_s12 }
  0x8b   : > { %s737_s7 = sshll.u32 %s593_s10, 7  ;;  %s1419_s24 = sld [smem:[#allocation19_spill]] }
  0x8c   : > { %s582_s19 = scalar_lea.sflag [#allocation5], %s1299_s0  ;;  %s953_s18 = scalar_lea.vmem %s1334_s12, 128 }
  0x8d   : > { %p954_p13 = scmp.ne.s32.totalorder %s1334_s12, %s953_s18  ;;  %p1420_p3 = scmp.ne.s32.totalorder %s1411_s30, 0 }
  0x8e   : > { %s1072_s27 = smov [#allocation9]  }
  0x8f   : > { %p955_p7 = pnand %p954_p13, %p1420_p3  ;;  %s957_s8 = sshll.u32 %s1072_s27, 4  ;;  %s958_s8 = int_to_ptr.vmem [resolvable:$false] %s957_s8 }
  0x90   : > { %s959_s15 = scalar_lea.vmem %s958_s8, 256  ;;  %p960_p2 = scmp.lt.s32.totalorder %s1334_s12, %s958_s8 }
  0x91   : > { %s1332_s4 = scalar_lea.hbm %s1419_s24, %s737_s7  ;;  %p956_p1 = pneg %p955_p7 }
  0x92   : > { %p961_p4 = scmp.lt.s32.totalorder %s959_s15, %s953_s18 }
  0x94   : > { %p962_p9 = por %p961_p4, %p960_p2 }
  0x96   : > { %p963_p6 = pnand %p962_p9, %p956_p1 }
  0xb0   : > { %864 = vset.pattern.permute.xlu0 %v1070_v5 }
  0xf9   : > { %v337_v8 = vpop.permute.xlu1 %336 }
 0x107   : > { %v304_v2 = vpop.trf.xlu0 }
 0x108   : > { %321 = vrot.lane.b32.xlu0 %v304_v2, %s1067_s9 }
 0x17a   : > { %v322_v4 = vpop.permute.xlu0 %321 }
 0x17b   : > { %325 = vst.msk [vmem:[#allocation2] sm:$0xff] %vm324_vm0, %v322_v4 }
 0x182   : > { %v328_v6 = vld [vmem:[#allocation2] sm:$0xff] }
 0x183   : > { %334 = vrot.lane.b32.xlu1 %v328_v6, %s1066_s29 }
 0x187   : > { %415 = vrot.lane.b32.xlu1 %v328_v6, %s1071_s23 }
 0x18b   : > { %417 = vrot.lane.b32.xlu1 %v286_v1, %s1071_s23 }
 0x18f   : > { %574 = vperm.xlu1 %863, %v571_v7  }
 0x1f5   : > { %v335_v9 = vpop.permute.xlu1 %334 }
 0x1f6   : > { %v339_v11 = vsel %vm338_vm2, %v335_v9, %v337_v8 }
 0x1f7   : > { %747 = vmatpush3.msra.mxu0 %v339_v11 }
 0x1f8   : > { %749 = vmatmul.mubr.msk.f32.vlgmr.msra.gmra.mrb[0].mxu0 %vm341_vm3, %v331_v10  ;;  %756 = vmatprep.subr.mxu0 %v1068_v3 }
 0x1f9   : > { %v416_v12 = vpop.permute.xlu1 %415  ;;  %757 = vmatpush3.msra.mxu0 %v286_v1  ;;  %758 = vmatprep.mubr.msk.f32.mxu0 %vm1069_vm1, %v1068_v3 }
 0x1fc   : > { %759 = vmatmul.mubr.msk.f32.vlgmr.msra.gmra.mrb[2].mxu0 %vm341_vm3, %v496_v13 }
 0x1fd   : > { %v418_v14 = vpop.permute.xlu1 %417 }
 0x1fe   : > { %v420_v16 = vsel %vm419_vm4, %v416_v12, %v418_v14 }
 0x1ff   : > { %752 = vmatpush3.msra.mxu1 %v420_v16 }
 0x200   : > { %754 = vmatmul.mubr.msk.f32.vlgmr.msra.gmra.mrb[0].mxu1 %vm341_vm3, %v327_v15 }
 0x20e   : > { %v575_v24 = vpop.permute.xlu1 %574 }
 0x2cb   : > { %v411_v17 = vpop.f32.mrb[0].mxu0 }
 0x2cc   : > { %v750_v18 = vpop.f32.mrb[1].mxu0 }
 0x2cf   : > { %v566_v19 = vpop.f32.mrb[2].mxu0 }
 0x2d0   : > { %v760_v20 = vpop.f32.mrb[3].mxu0 }
 0x2d3   : > { %v491_v21 = vpop.f32.mrb[0].mxu1 }
 0x2d4   : > { %v492_v22 = vadd.f32 %v491_v21, %v411_v17  ;;  %v755_v23 = vpop.f32.mrb[1].mxu1 }
 0x2d6   : > { %v570_v25 = vadd.f32 %v566_v19, %v492_v22 }
 0x2d8   : > { %v577_v26 = vadd.f32 %v575_v24, %v570_v25 }
 0x2da   : > { %v578_v27 = vmax.f32 %v577_v26, 0.0 }
 0x2dc   : > { %v579_v28 = vadd.f32 %v578_v27, %v286_v1 }
 0x2de   : > { %580 = vst [vmem:[%s285_s11] sm:$0xff] %v579_v28 }
 0x2df   : > { %966 = shalt.err (!%p963_p6)
}
 0x2e0   : > { %s967_s0 = scalar_lea.hbm %s1332_s4, 128  ;;  %s971_s9 = scalar_lea.hbm %s1419_s24, 512 }
 0x2e1   : > { %p968_p10 = scmp.ne.s32.totalorder %s1332_s4, %s967_s0  ;;  %p972_p5 = scmp.lt.u32.totalorder %s1332_s4, %s1419_s24 }
 0x2e2   : > { %p973_p11 = scmp.lt.u32.totalorder %s971_s9, %s967_s0  ;;  %p975_p13 = scmp.lt.u32.totalorder %s967_s0, %s1332_s4 }
 0x2e3   : > { %p969_p12 = pnand %p968_p10, %p1420_p3 }
 0x2e4   : > { %p974_p0 = por %p973_p11, %p972_p5 }
 0x2e5   : > { %p970_p8 = pneg %p969_p12 }
 0x2e6   : > { %p976_p7 = por %p975_p13, %p974_p0 }
 0x2e8   : > { %p977_p1 = pnand %p976_p7, %p970_p8 }
 0x2ea   : > { %980 = shalt.err (!%p977_p1)
}
 0x2eb   : > { %769 = dma.vmem_to_hbm [thread:$0]  (%p1420_p3), %s1334_s12, 128, %s1332_s4, %s582_s19  }
 0x2ec PF: > { %s1421_s14 = sld [smem:[#allocation14_spill]]  ;;  %s1422_s28 = sld [smem:[#allocation15_spill]] }
 0x2ed   : > { %p789_p2 = scmp.ge.s32.totalorder %s1059_s22, 2 }
 0x2f2   : > { %s609_s10 = sand.u32 1, %s1421_s14   ;;  %p1423_p4 = scmp.ne.s32.totalorder %s1422_s28, 0 }
 0x2f3   : > { %s610_s7 = scalar_lea.sflag [#allocation5], %s609_s10 }
 0x2f4   : > { %p783_p9 = pnand %p789_p2, %p1423_p4 }
 0x2f6   : > { %1026 = dma.done.wait (!%p783_p9), %s610_s7, 128  }
 0x2f7   : > { %1028 = vsyncadd (!%p783_p9), %s610_s7, 4294967168  ;;  %s23_s22 = sadd.s32 1, %s1059_s22   ;;  %s1424_s30 = sld [smem:[#allocation16_spill]] }
 0x2f8   : > { %p20_p6 = scmp.ge.s32.totalorder %s23_s22, 6   ;;  %s1425_s15 = smov %s1035_s16 }
 0x2f9   : > { %s1426_s16 = smov %s1039_s17  ;;  %s1427_s17 = smov %s1221_s2 }
 0x2fa   : > { %s1428_s18 = smov %s1051_s20  ;;  %s1429_s19 = smov %s1055_s21 }
 0x2fb   : > { %s1431_s21 = smov %s1437_s6  ;;  %22 = sbr.rel (!%p20_p6) target bundleno = 13 (0xd), region = 100 }
 0x2fd   : > { %s1430_s20 = smov %s1424_s30 }
 0x302   :  { %615 = vsyncpa [#allocation4], 1 }
 0x303   :  { %617 = vsyncpa [#allocation4 + $0x1], 1 }
 0x304   :  { %618 = vsyncpa [#allocation7], 1 }
 0x305   :  { %620 = vsyncpa [#allocation7 + $0x1], 1 }
 0x306   :  { %621 = vsyncpa [#allocation5], 1 }
 0x307   :  { %623 = vsyncpa [#allocation5 + $0x1], 1 }

</bundles_post_ra>
